<compile_context>
chip_gen: v6e
topology: v6e:2x2x1
jax: 0.10.0
libtpu: 0.0.40
codegen_flags: <defaults>
</compile_context>

<pallas_src>
import functools

import jax
import jax.numpy as jnp
from jax.experimental import pallas as pl
from jax.experimental.pallas import tpu as pltpu


def _seg_kernel(x_ref, w_ref, b_ref, o_ref, *, chunk):
    """x_ref: (TN, Cin, TR, 128) VMEM.   w_ref: (Cout, Cin) SMEM (BN-folded conv weight).
    b_ref: (Cout,) SMEM (BN-folded bias). o_ref: (TN, Cout, TR, 128) VMEM."""
    tn, cin, tr, _ = x_ref.shape
    cout = o_ref.shape[1]
    n_chunks = tr // chunk  # wrapper guarantees tr % chunk == 0

    # Hoist the tiny folded weights / bias into scalars once per kernel call
    # (keeps SMEM scalar loads off the per-chunk critical path).
    w = [[w_ref[co, ci] for ci in range(cin)] for co in range(cout)]
    b = [b_ref[co] for co in range(cout)]

    @pl.loop(0, n_chunks)
    def _(c):
        r0 = pl.multiple_of(c * chunk, chunk)
        for n in range(tn):
            # Dense (chunk, 128) tiles per input channel; f32 accumulate also
            # covers bf16 I/O.
            xs = [x_ref[n, ci, pl.ds(r0, chunk), :].astype(jnp.float32)
                  for ci in range(cin)]
            for co in range(cout):
                acc = xs[0] * w[co][0] + b[co]
                for ci in range(1, cin):
                    acc = acc + xs[ci] * w[co][ci]
                # Full-vreg, unmasked store of a dense (chunk, 128) tile.
                o_ref[n, co, pl.ds(r0, chunk), :] = acc.astype(o_ref.dtype)


def _round_up(x, m):
    return (x + m - 1) // m * m


def _pick_tiles(n_batch, n_rows, cin, cout, itemsize, sub, target_bytes):
    """Pick (tn, tr): batch elements and 128-lane rows per block.

    tr is a multiple of `sub` that exactly divides n_rows (n_rows is padded to a
    multiple of `sub` by the wrapper), chosen as the largest such divisor whose
    (in+out) footprint stays under target_bytes.  Batch packing only kicks in
    when the full spatial extent alone is far below the target, and is capped so
    the batch grid axis keeps >= 2 steps when N >= 2 (v7x has 2 TensorCores)."""
    per_row = (cin + cout) * 128 * itemsize          # in+out bytes per dense row
    max_rows = max(sub, target_bytes // per_row)
    if n_rows <= max_rows:
        tr = n_rows                                  # full extent: always legal
    else:
        tr = sub                                     # sub always divides n_rows
        d = sub
        while d <= max_rows:
            if n_rows % d == 0:
                tr = d
            d += sub
    tn = 1
    if tr == n_rows:
        cap = max(1, n_batch // 2)
        while (tn * 2 <= cap and n_batch % (tn * 2) == 0
               and (tn * 2) * n_rows * per_row <= target_bytes):
            tn *= 2
    return tn, tr


def single_linear_forward(x_nchw, gamma, beta, running_mean, running_var,
                          conv_w, conv_b, *, eps=1e-5,
                          target_block_bytes=4 * 1024 * 1024):
    """SingleLinear.forward: SyncBatchNorm (eval) -> 1x1 Conv2d.

    x_nchw: (N, Cin, H, W).  conv_w: (Cout, Cin, 1, 1).  Returns (N, Cout, H, W)."""
    N, Cin, H, W = x_nchw.shape
    Cout = conv_w.shape[0]
    HW = H * W
    itemsize = x_nchw.dtype.itemsize
    sub = max(8, 32 // itemsize)   # packed sublanes per vreg: 8 for f32, 16 for bf16
    chunk = sub                    # rows per in-kernel compute step

    # Fold BN into the conv: O(Cin*Cout) work once, not a pass over x.
    scale = gamma / jnp.sqrt(running_var + eps)                 # (Cin,)
    shift = beta - running_mean * scale                         # (Cin,)
    w2d = conv_w.reshape(Cout, Cin).astype(jnp.float32)
    w_folded = w2d * scale[None, :]                             # (Cout, Cin)
    b_folded = w2d @ shift + conv_b.astype(jnp.float32)         # (Cout,)

    # NCHW-native, lane+sublane-dense layout: (N, Cin, HW/128, 128).
    hw_pad = _round_up(HW, sub * 128)
    x3 = x_nchw.reshape(N, Cin, HW)
    if hw_pad != HW:
        x3 = jnp.pad(x3, ((0, 0), (0, 0), (0, hw_pad - HW)))
    n_rows = hw_pad // 128
    x4 = x3.reshape(N, Cin, n_rows, 128)

    tn, tr = _pick_tiles(N, n_rows, Cin, Cout, itemsize, sub, target_block_bytes)
    grid = (N // tn, n_rows // tr)

    out4 = pl.pallas_call(
        functools.partial(_seg_kernel, chunk=chunk),
        out_shape=jax.ShapeDtypeStruct((N, Cout, n_rows, 128), x_nchw.dtype),
        grid=grid,
        in_specs=[
            pl.BlockSpec((tn, Cin, tr, 128), lambda b, r: (b, 0, r, 0)),  # dense x tile
            pl.BlockSpec(memory_space=pltpu.MemorySpace.SMEM),            # folded weight
            pl.BlockSpec(memory_space=pltpu.MemorySpace.SMEM),            # folded bias
        ],
        out_specs=pl.BlockSpec((tn, Cout, tr, 128), lambda b, r: (b, 0, r, 0)),
        compiler_params=pltpu.CompilerParams(
            dimension_semantics=("parallel", "parallel"),
            # ~4 MiB (in+out) per step, double-buffered, stays well under this;
            # 32 MiB also respects v7x's smaller scoped/physical VMEM.
            vmem_limit_bytes=32 * 1024 * 1024,
        ),
    )(x4, w_folded, b_folded)

    out = out4.reshape(N, Cout, hw_pad)
    if hw_pad != HW:
        out = out[:, :, :HW]
    return out.reshape(N, Cout, H, W)


if __name__ == "__main__":
    # Small shapes consistent with the module: N=2, Cin=4, H=W=16, Cout=8.
    N, Cin, H, W, Cout = 2, 4, 16, 16, 8
    eps = 1e-5

    key = jax.random.PRNGKey(0)
    kx, kg, kb, km, kv, kw, kcb = jax.random.split(key, 7)

    x = jax.random.normal(kx, (N, Cin, H, W), dtype=jnp.float32)

    gamma = 1.0 + 0.1 * jax.random.normal(kg, (Cin,), dtype=jnp.float32)
    beta = 0.1 * jax.random.normal(kb, (Cin,), dtype=jnp.float32)
    running_mean = 0.1 * jax.random.normal(km, (Cin,), dtype=jnp.float32)
    running_var = 1.0 + 0.1 * jnp.abs(jax.random.normal(kv, (Cin,), dtype=jnp.float32))
    conv_w = 0.1 * jax.random.normal(kw, (Cout, Cin, 1, 1), dtype=jnp.float32)
    conv_b = 0.1 * jax.random.normal(kcb, (Cout,), dtype=jnp.float32)

    # TODO(synk): `upscaler` is None in this config; no upscaling implemented.

    out = single_linear_forward(x, gamma, beta, running_mean, running_var,
                                conv_w, conv_b, eps=eps)
    out = jax.block_until_ready(out)

    # Pure-JAX reference (BN eval + 1x1 conv).
    scale = gamma / jnp.sqrt(running_var + eps)
    shift = beta - running_mean * scale
    xn = x * scale[None, :, None, None] + shift[None, :, None, None]
    ref = jnp.einsum("nchw,oc->nohw", xn, conv_w.reshape(Cout, Cin)) \
        + conv_b[None, :, None, None]
    assert out.shape == (N, Cout, H, W)
    assert jnp.allclose(out, ref, atol=1e-4, rtol=1e-4)

    print("KERNEL_OK")
</pallas_src>

<mosaic_0001>
module attributes {stable_mosaic.version = 11 : i64} {
  func.func @_seg_kernel(%arg0: i32, %arg1: i32, %arg2: memref<1x4x8x128xf32, #tpu.memory_space<vmem>>, %arg3: memref<8x4xf32, #tpu.memory_space<smem>>, %arg4: memref<8xf32, #tpu.memory_space<smem>>, %arg5: memref<1x8x8x128xf32, #tpu.memory_space<vmem>>) attributes {dimension_semantics = [#tpu.dimension_semantics<parallel>, #tpu.dimension_semantics<parallel>], iteration_bounds = array<i64: 2, 1>, scalar_prefetch = 0 : i64, scratch_operands = 0 : i64, tpu.core_type = #tpu.core_type<tc>, window_params = [{transform_indices = @transform_0, window_bounds = array<i64: 1, 4, 8, 128>}, {transform_indices = @transform_1, window_bounds = array<i64: 8, 4>}, {transform_indices = @transform_2, window_bounds = array<i64: 8>}, {transform_indices = @transform_3, window_bounds = array<i64: 1, 8, 8, 128>}]} {
    %c0 = arith.constant 0 : index
    %c0_0 = arith.constant 0 : index
    %0 = memref.load %arg3[%c0, %c0_0] : memref<8x4xf32, #tpu.memory_space<smem>>
    %c0_1 = arith.constant 0 : index
    %c1 = arith.constant 1 : index
    %1 = memref.load %arg3[%c0_1, %c1] : memref<8x4xf32, #tpu.memory_space<smem>>
    %c0_2 = arith.constant 0 : index
    %c2 = arith.constant 2 : index
    %2 = memref.load %arg3[%c0_2, %c2] : memref<8x4xf32, #tpu.memory_space<smem>>
    %c0_3 = arith.constant 0 : index
    %c3 = arith.constant 3 : index
    %3 = memref.load %arg3[%c0_3, %c3] : memref<8x4xf32, #tpu.memory_space<smem>>
    %c1_4 = arith.constant 1 : index
    %c0_5 = arith.constant 0 : index
    %4 = memref.load %arg3[%c1_4, %c0_5] : memref<8x4xf32, #tpu.memory_space<smem>>
    %c1_6 = arith.constant 1 : index
    %c1_7 = arith.constant 1 : index
    %5 = memref.load %arg3[%c1_6, %c1_7] : memref<8x4xf32, #tpu.memory_space<smem>>
    %c1_8 = arith.constant 1 : index
    %c2_9 = arith.constant 2 : index
    %6 = memref.load %arg3[%c1_8, %c2_9] : memref<8x4xf32, #tpu.memory_space<smem>>
    %c1_10 = arith.constant 1 : index
    %c3_11 = arith.constant 3 : index
    %7 = memref.load %arg3[%c1_10, %c3_11] : memref<8x4xf32, #tpu.memory_space<smem>>
    %c2_12 = arith.constant 2 : index
    %c0_13 = arith.constant 0 : index
    %8 = memref.load %arg3[%c2_12, %c0_13] : memref<8x4xf32, #tpu.memory_space<smem>>
    %c2_14 = arith.constant 2 : index
    %c1_15 = arith.constant 1 : index
    %9 = memref.load %arg3[%c2_14, %c1_15] : memref<8x4xf32, #tpu.memory_space<smem>>
    %c2_16 = arith.constant 2 : index
    %c2_17 = arith.constant 2 : index
    %10 = memref.load %arg3[%c2_16, %c2_17] : memref<8x4xf32, #tpu.memory_space<smem>>
    %c2_18 = arith.constant 2 : index
    %c3_19 = arith.constant 3 : index
    %11 = memref.load %arg3[%c2_18, %c3_19] : memref<8x4xf32, #tpu.memory_space<smem>>
    %c3_20 = arith.constant 3 : index
    %c0_21 = arith.constant 0 : index
    %12 = memref.load %arg3[%c3_20, %c0_21] : memref<8x4xf32, #tpu.memory_space<smem>>
    %c3_22 = arith.constant 3 : index
    %c1_23 = arith.constant 1 : index
    %13 = memref.load %arg3[%c3_22, %c1_23] : memref<8x4xf32, #tpu.memory_space<smem>>
    %c3_24 = arith.constant 3 : index
    %c2_25 = arith.constant 2 : index
    %14 = memref.load %arg3[%c3_24, %c2_25] : memref<8x4xf32, #tpu.memory_space<smem>>
    %c3_26 = arith.constant 3 : index
    %c3_27 = arith.constant 3 : index
    %15 = memref.load %arg3[%c3_26, %c3_27] : memref<8x4xf32, #tpu.memory_space<smem>>
    %c4 = arith.constant 4 : index
    %c0_28 = arith.constant 0 : index
    %16 = memref.load %arg3[%c4, %c0_28] : memref<8x4xf32, #tpu.memory_space<smem>>
    %c4_29 = arith.constant 4 : index
    %c1_30 = arith.constant 1 : index
    %17 = memref.load %arg3[%c4_29, %c1_30] : memref<8x4xf32, #tpu.memory_space<smem>>
    %c4_31 = arith.constant 4 : index
    %c2_32 = arith.constant 2 : index
    %18 = memref.load %arg3[%c4_31, %c2_32] : memref<8x4xf32, #tpu.memory_space<smem>>
    %c4_33 = arith.constant 4 : index
    %c3_34 = arith.constant 3 : index
    %19 = memref.load %arg3[%c4_33, %c3_34] : memref<8x4xf32, #tpu.memory_space<smem>>
    %c5 = arith.constant 5 : index
    %c0_35 = arith.constant 0 : index
    %20 = memref.load %arg3[%c5, %c0_35] : memref<8x4xf32, #tpu.memory_space<smem>>
    %c5_36 = arith.constant 5 : index
    %c1_37 = arith.constant 1 : index
    %21 = memref.load %arg3[%c5_36, %c1_37] : memref<8x4xf32, #tpu.memory_space<smem>>
    %c5_38 = arith.constant 5 : index
    %c2_39 = arith.constant 2 : index
    %22 = memref.load %arg3[%c5_38, %c2_39] : memref<8x4xf32, #tpu.memory_space<smem>>
    %c5_40 = arith.constant 5 : index
    %c3_41 = arith.constant 3 : index
    %23 = memref.load %arg3[%c5_40, %c3_41] : memref<8x4xf32, #tpu.memory_space<smem>>
    %c6 = arith.constant 6 : index
    %c0_42 = arith.constant 0 : index
    %24 = memref.load %arg3[%c6, %c0_42] : memref<8x4xf32, #tpu.memory_space<smem>>
    %c6_43 = arith.constant 6 : index
    %c1_44 = arith.constant 1 : index
    %25 = memref.load %arg3[%c6_43, %c1_44] : memref<8x4xf32, #tpu.memory_space<smem>>
    %c6_45 = arith.constant 6 : index
    %c2_46 = arith.constant 2 : index
    %26 = memref.load %arg3[%c6_45, %c2_46] : memref<8x4xf32, #tpu.memory_space<smem>>
    %c6_47 = arith.constant 6 : index
    %c3_48 = arith.constant 3 : index
    %27 = memref.load %arg3[%c6_47, %c3_48] : memref<8x4xf32, #tpu.memory_space<smem>>
    %c7 = arith.constant 7 : index
    %c0_49 = arith.constant 0 : index
    %28 = memref.load %arg3[%c7, %c0_49] : memref<8x4xf32, #tpu.memory_space<smem>>
    %c7_50 = arith.constant 7 : index
    %c1_51 = arith.constant 1 : index
    %29 = memref.load %arg3[%c7_50, %c1_51] : memref<8x4xf32, #tpu.memory_space<smem>>
    %c7_52 = arith.constant 7 : index
    %c2_53 = arith.constant 2 : index
    %30 = memref.load %arg3[%c7_52, %c2_53] : memref<8x4xf32, #tpu.memory_space<smem>>
    %c7_54 = arith.constant 7 : index
    %c3_55 = arith.constant 3 : index
    %31 = memref.load %arg3[%c7_54, %c3_55] : memref<8x4xf32, #tpu.memory_space<smem>>
    %c0_56 = arith.constant 0 : index
    %32 = memref.load %arg4[%c0_56] : memref<8xf32, #tpu.memory_space<smem>>
    %c1_57 = arith.constant 1 : index
    %33 = memref.load %arg4[%c1_57] : memref<8xf32, #tpu.memory_space<smem>>
    %c2_58 = arith.constant 2 : index
    %34 = memref.load %arg4[%c2_58] : memref<8xf32, #tpu.memory_space<smem>>
    %c3_59 = arith.constant 3 : index
    %35 = memref.load %arg4[%c3_59] : memref<8xf32, #tpu.memory_space<smem>>
    %c4_60 = arith.constant 4 : index
    %36 = memref.load %arg4[%c4_60] : memref<8xf32, #tpu.memory_space<smem>>
    %c5_61 = arith.constant 5 : index
    %37 = memref.load %arg4[%c5_61] : memref<8xf32, #tpu.memory_space<smem>>
    %c6_62 = arith.constant 6 : index
    %38 = memref.load %arg4[%c6_62] : memref<8xf32, #tpu.memory_space<smem>>
    %c7_63 = arith.constant 7 : index
    %39 = memref.load %arg4[%c7_63] : memref<8xf32, #tpu.memory_space<smem>>
    %c0_i32 = arith.constant 0 : i32
    %c1_i32 = arith.constant 1 : i32
    %40 = arith.muli %c0_i32, %c1_i32 : i32
    %c0_i32_64 = arith.constant 0 : i32
    %41 = arith.addi %c0_i32_64, %40 : i32
    %c8_i32 = arith.constant 8 : i32
    %42 = arith.muli %41, %c8_i32 : i32
    %43 = tpu.assume_multiple %42, 8 : i32
    %c0_65 = arith.constant 0 : index
    %c0_66 = arith.constant 0 : index
    %44 = arith.index_cast %43 : i32 to index
    %c0_67 = arith.constant 0 : index
    %45 = vector.load %arg2[%c0_65, %c0_66, %44, %c0_67] : memref<1x4x8x128xf32, #tpu.memory_space<vmem>>, vector<1x1x8x128xf32>
    %46 = vector.shape_cast %45 : vector<1x1x8x128xf32> to vector<8x128xf32>
    %c0_68 = arith.constant 0 : index
    %c1_69 = arith.constant 1 : index
    %47 = arith.index_cast %43 : i32 to index
    %c0_70 = arith.constant 0 : index
    %48 = vector.load %arg2[%c0_68, %c1_69, %47, %c0_70] : memref<1x4x8x128xf32, #tpu.memory_space<vmem>>, vector<1x1x8x128xf32>
    %49 = vector.shape_cast %48 : vector<1x1x8x128xf32> to vector<8x128xf32>
    %c0_71 = arith.constant 0 : index
    %c2_72 = arith.constant 2 : index
    %50 = arith.index_cast %43 : i32 to index
    %c0_73 = arith.constant 0 : index
    %51 = vector.load %arg2[%c0_71, %c2_72, %50, %c0_73] : memref<1x4x8x128xf32, #tpu.memory_space<vmem>>, vector<1x1x8x128xf32>
    %52 = vector.shape_cast %51 : vector<1x1x8x128xf32> to vector<8x128xf32>
    %c0_74 = arith.constant 0 : index
    %c3_75 = arith.constant 3 : index
    %53 = arith.index_cast %43 : i32 to index
    %c0_76 = arith.constant 0 : index
    %54 = vector.load %arg2[%c0_74, %c3_75, %53, %c0_76] : memref<1x4x8x128xf32, #tpu.memory_space<vmem>>, vector<1x1x8x128xf32>
    %55 = vector.shape_cast %54 : vector<1x1x8x128xf32> to vector<8x128xf32>
    %56 = vector.broadcast %0 : f32 to vector<8x128xf32>
    %57 = arith.mulf %46, %56 : vector<8x128xf32>
    %58 = vector.broadcast %32 : f32 to vector<8x128xf32>
    %59 = arith.addf %57, %58 : vector<8x128xf32>
    %60 = vector.broadcast %1 : f32 to vector<8x128xf32>
    %61 = arith.mulf %49, %60 : vector<8x128xf32>
    %62 = arith.addf %59, %61 : vector<8x128xf32>
    %63 = vector.broadcast %2 : f32 to vector<8x128xf32>
    %64 = arith.mulf %52, %63 : vector<8x128xf32>
    %65 = arith.addf %62, %64 : vector<8x128xf32>
    %66 = vector.broadcast %3 : f32 to vector<8x128xf32>
    %67 = arith.mulf %55, %66 : vector<8x128xf32>
    %68 = arith.addf %65, %67 : vector<8x128xf32>
    %c0_77 = arith.constant 0 : index
    %c0_78 = arith.constant 0 : index
    %69 = arith.index_cast %43 : i32 to index
    %c0_79 = arith.constant 0 : index
    %70 = vector.load %arg5[%c0_77, %c0_78, %69, %c0_79] : memref<1x8x8x128xf32, #tpu.memory_space<vmem>>, vector<1x1x8x128xf32>
    %71 = vector.shape_cast %70 : vector<1x1x8x128xf32> to vector<8x128xf32>
    %72 = vector.shape_cast %68 : vector<8x128xf32> to vector<1x1x8x128xf32>
    tpu.vector_store %arg5[%c0_77, %c0_78, %69, %c0_79], %72 {strides = array<i32>} : memref<1x8x8x128xf32, #tpu.memory_space<vmem>>, vector<1x1x8x128xf32>,
    %73 = vector.broadcast %4 : f32 to vector<8x128xf32>
    %74 = arith.mulf %46, %73 : vector<8x128xf32>
    %75 = vector.broadcast %33 : f32 to vector<8x128xf32>
    %76 = arith.addf %74, %75 : vector<8x128xf32>
    %77 = vector.broadcast %5 : f32 to vector<8x128xf32>
    %78 = arith.mulf %49, %77 : vector<8x128xf32>
    %79 = arith.addf %76, %78 : vector<8x128xf32>
    %80 = vector.broadcast %6 : f32 to vector<8x128xf32>
    %81 = arith.mulf %52, %80 : vector<8x128xf32>
    %82 = arith.addf %79, %81 : vector<8x128xf32>
    %83 = vector.broadcast %7 : f32 to vector<8x128xf32>
    %84 = arith.mulf %55, %83 : vector<8x128xf32>
    %85 = arith.addf %82, %84 : vector<8x128xf32>
    %c0_80 = arith.constant 0 : index
    %c1_81 = arith.constant 1 : index
    %86 = arith.index_cast %43 : i32 to index
    %c0_82 = arith.constant 0 : index
    %87 = vector.load %arg5[%c0_80, %c1_81, %86, %c0_82] : memref<1x8x8x128xf32, #tpu.memory_space<vmem>>, vector<1x1x8x128xf32>
    %88 = vector.shape_cast %87 : vector<1x1x8x128xf32> to vector<8x128xf32>
    %89 = vector.shape_cast %85 : vector<8x128xf32> to vector<1x1x8x128xf32>
    tpu.vector_store %arg5[%c0_80, %c1_81, %86, %c0_82], %89 {strides = array<i32>} : memref<1x8x8x128xf32, #tpu.memory_space<vmem>>, vector<1x1x8x128xf32>,
    %90 = vector.broadcast %8 : f32 to vector<8x128xf32>
    %91 = arith.mulf %46, %90 : vector<8x128xf32>
    %92 = vector.broadcast %34 : f32 to vector<8x128xf32>
    %93 = arith.addf %91, %92 : vector<8x128xf32>
    %94 = vector.broadcast %9 : f32 to vector<8x128xf32>
    %95 = arith.mulf %49, %94 : vector<8x128xf32>
    %96 = arith.addf %93, %95 : vector<8x128xf32>
    %97 = vector.broadcast %10 : f32 to vector<8x128xf32>
    %98 = arith.mulf %52, %97 : vector<8x128xf32>
    %99 = arith.addf %96, %98 : vector<8x128xf32>
    %100 = vector.broadcast %11 : f32 to vector<8x128xf32>
    %101 = arith.mulf %55, %100 : vector<8x128xf32>
    %102 = arith.addf %99, %101 : vector<8x128xf32>
    %c0_83 = arith.constant 0 : index
    %c2_84 = arith.constant 2 : index
    %103 = arith.index_cast %43 : i32 to index
    %c0_85 = arith.constant 0 : index
    %104 = vector.load %arg5[%c0_83, %c2_84, %103, %c0_85] : memref<1x8x8x128xf32, #tpu.memory_space<vmem>>, vector<1x1x8x128xf32>
    %105 = vector.shape_cast %104 : vector<1x1x8x128xf32> to vector<8x128xf32>
    %106 = vector.shape_cast %102 : vector<8x128xf32> to vector<1x1x8x128xf32>
    tpu.vector_store %arg5[%c0_83, %c2_84, %103, %c0_85], %106 {strides = array<i32>} : memref<1x8x8x128xf32, #tpu.memory_space<vmem>>, vector<1x1x8x128xf32>,
    %107 = vector.broadcast %12 : f32 to vector<8x128xf32>
    %108 = arith.mulf %46, %107 : vector<8x128xf32>
    %109 = vector.broadcast %35 : f32 to vector<8x128xf32>
    %110 = arith.addf %108, %109 : vector<8x128xf32>
    %111 = vector.broadcast %13 : f32 to vector<8x128xf32>
    %112 = arith.mulf %49, %111 : vector<8x128xf32>
    %113 = arith.addf %110, %112 : vector<8x128xf32>
    %114 = vector.broadcast %14 : f32 to vector<8x128xf32>
    %115 = arith.mulf %52, %114 : vector<8x128xf32>
    %116 = arith.addf %113, %115 : vector<8x128xf32>
    %117 = vector.broadcast %15 : f32 to vector<8x128xf32>
    %118 = arith.mulf %55, %117 : vector<8x128xf32>
    %119 = arith.addf %116, %118 : vector<8x128xf32>
    %c0_86 = arith.constant 0 : index
    %c3_87 = arith.constant 3 : index
    %120 = arith.index_cast %43 : i32 to index
    %c0_88 = arith.constant 0 : index
    %121 = vector.load %arg5[%c0_86, %c3_87, %120, %c0_88] : memref<1x8x8x128xf32, #tpu.memory_space<vmem>>, vector<1x1x8x128xf32>
    %122 = vector.shape_cast %121 : vector<1x1x8x128xf32> to vector<8x128xf32>
    %123 = vector.shape_cast %119 : vector<8x128xf32> to vector<1x1x8x128xf32>
    tpu.vector_store %arg5[%c0_86, %c3_87, %120, %c0_88], %123 {strides = array<i32>} : memref<1x8x8x128xf32, #tpu.memory_space<vmem>>, vector<1x1x8x128xf32>,
    %124 = vector.broadcast %16 : f32 to vector<8x128xf32>
    %125 = arith.mulf %46, %124 : vector<8x128xf32>
    %126 = vector.broadcast %36 : f32 to vector<8x128xf32>
    %127 = arith.addf %125, %126 : vector<8x128xf32>
    %128 = vector.broadcast %17 : f32 to vector<8x128xf32>
    %129 = arith.mulf %49, %128 : vector<8x128xf32>
    %130 = arith.addf %127, %129 : vector<8x128xf32>
    %131 = vector.broadcast %18 : f32 to vector<8x128xf32>
    %132 = arith.mulf %52, %131 : vector<8x128xf32>
    %133 = arith.addf %130, %132 : vector<8x128xf32>
    %134 = vector.broadcast %19 : f32 to vector<8x128xf32>
    %135 = arith.mulf %55, %134 : vector<8x128xf32>
    %136 = arith.addf %133, %135 : vector<8x128xf32>
    %c0_89 = arith.constant 0 : index
    %c4_90 = arith.constant 4 : index
    %137 = arith.index_cast %43 : i32 to index
    %c0_91 = arith.constant 0 : index
    %138 = vector.load %arg5[%c0_89, %c4_90, %137, %c0_91] : memref<1x8x8x128xf32, #tpu.memory_space<vmem>>, vector<1x1x8x128xf32>
    %139 = vector.shape_cast %138 : vector<1x1x8x128xf32> to vector<8x128xf32>
    %140 = vector.shape_cast %136 : vector<8x128xf32> to vector<1x1x8x128xf32>
    tpu.vector_store %arg5[%c0_89, %c4_90, %137, %c0_91], %140 {strides = array<i32>} : memref<1x8x8x128xf32, #tpu.memory_space<vmem>>, vector<1x1x8x128xf32>,
    %141 = vector.broadcast %20 : f32 to vector<8x128xf32>
    %142 = arith.mulf %46, %141 : vector<8x128xf32>
    %143 = vector.broadcast %37 : f32 to vector<8x128xf32>
    %144 = arith.addf %142, %143 : vector<8x128xf32>
    %145 = vector.broadcast %21 : f32 to vector<8x128xf32>
    %146 = arith.mulf %49, %145 : vector<8x128xf32>
    %147 = arith.addf %144, %146 : vector<8x128xf32>
    %148 = vector.broadcast %22 : f32 to vector<8x128xf32>
    %149 = arith.mulf %52, %148 : vector<8x128xf32>
    %150 = arith.addf %147, %149 : vector<8x128xf32>
    %151 = vector.broadcast %23 : f32 to vector<8x128xf32>
    %152 = arith.mulf %55, %151 : vector<8x128xf32>
    %153 = arith.addf %150, %152 : vector<8x128xf32>
    %c0_92 = arith.constant 0 : index
    %c5_93 = arith.constant 5 : index
    %154 = arith.index_cast %43 : i32 to index
    %c0_94 = arith.constant 0 : index
    %155 = vector.load %arg5[%c0_92, %c5_93, %154, %c0_94] : memref<1x8x8x128xf32, #tpu.memory_space<vmem>>, vector<1x1x8x128xf32>
    %156 = vector.shape_cast %155 : vector<1x1x8x128xf32> to vector<8x128xf32>
    %157 = vector.shape_cast %153 : vector<8x128xf32> to vector<1x1x8x128xf32>
    tpu.vector_store %arg5[%c0_92, %c5_93, %154, %c0_94], %157 {strides = array<i32>} : memref<1x8x8x128xf32, #tpu.memory_space<vmem>>, vector<1x1x8x128xf32>,
    %158 = vector.broadcast %24 : f32 to vector<8x128xf32>
    %159 = arith.mulf %46, %158 : vector<8x128xf32>
    %160 = vector.broadcast %38 : f32 to vector<8x128xf32>
    %161 = arith.addf %159, %160 : vector<8x128xf32>
    %162 = vector.broadcast %25 : f32 to vector<8x128xf32>
    %163 = arith.mulf %49, %162 : vector<8x128xf32>
    %164 = arith.addf %161, %163 : vector<8x128xf32>
    %165 = vector.broadcast %26 : f32 to vector<8x128xf32>
    %166 = arith.mulf %52, %165 : vector<8x128xf32>
    %167 = arith.addf %164, %166 : vector<8x128xf32>
    %168 = vector.broadcast %27 : f32 to vector<8x128xf32>
    %169 = arith.mulf %55, %168 : vector<8x128xf32>
    %170 = arith.addf %167, %169 : vector<8x128xf32>
    %c0_95 = arith.constant 0 : index
    %c6_96 = arith.constant 6 : index
    %171 = arith.index_cast %43 : i32 to index
    %c0_97 = arith.constant 0 : index
    %172 = vector.load %arg5[%c0_95, %c6_96, %171, %c0_97] : memref<1x8x8x128xf32, #tpu.memory_space<vmem>>, vector<1x1x8x128xf32>
    %173 = vector.shape_cast %172 : vector<1x1x8x128xf32> to vector<8x128xf32>
    %174 = vector.shape_cast %170 : vector<8x128xf32> to vector<1x1x8x128xf32>
    tpu.vector_store %arg5[%c0_95, %c6_96, %171, %c0_97], %174 {strides = array<i32>} : memref<1x8x8x128xf32, #tpu.memory_space<vmem>>, vector<1x1x8x128xf32>,
    %175 = vector.broadcast %28 : f32 to vector<8x128xf32>
    %176 = arith.mulf %46, %175 : vector<8x128xf32>
    %177 = vector.broadcast %39 : f32 to vector<8x128xf32>
    %178 = arith.addf %176, %177 : vector<8x128xf32>
    %179 = vector.broadcast %29 : f32 to vector<8x128xf32>
    %180 = arith.mulf %49, %179 : vector<8x128xf32>
    %181 = arith.addf %178, %180 : vector<8x128xf32>
    %182 = vector.broadcast %30 : f32 to vector<8x128xf32>
    %183 = arith.mulf %52, %182 : vector<8x128xf32>
    %184 = arith.addf %181, %183 : vector<8x128xf32>
    %185 = vector.broadcast %31 : f32 to vector<8x128xf32>
    %186 = arith.mulf %55, %185 : vector<8x128xf32>
    %187 = arith.addf %184, %186 : vector<8x128xf32>
    %c0_98 = arith.constant 0 : index
    %c7_99 = arith.constant 7 : index
    %188 = arith.index_cast %43 : i32 to index
    %c0_100 = arith.constant 0 : index
    %189 = vector.load %arg5[%c0_98, %c7_99, %188, %c0_100] : memref<1x8x8x128xf32, #tpu.memory_space<vmem>>, vector<1x1x8x128xf32>
    %190 = vector.shape_cast %189 : vector<1x1x8x128xf32> to vector<8x128xf32>
    %191 = vector.shape_cast %187 : vector<8x128xf32> to vector<1x1x8x128xf32>
    tpu.vector_store %arg5[%c0_98, %c7_99, %188, %c0_100], %191 {strides = array<i32>} : memref<1x8x8x128xf32, #tpu.memory_space<vmem>>, vector<1x1x8x128xf32>,
    %c1_i32_101 = arith.constant 1 : i32
    return
  }
  func.func @transform_0(%arg0: i32, %arg1: i32) -> (i32, i32, i32, i32) {
    %c0_i32 = arith.constant 0 : i32
    %c0_i32_0 = arith.constant 0 : i32
    %c0_i32_1 = arith.constant 0 : i32
    return %arg0, %c0_i32, %arg1, %c0_i32_0 : i32, i32, i32, i32
  }
  func.func @transform_1(%arg0: i32, %arg1: i32) -> (i32, i32) {
    %c0_i32 = arith.constant 0 : i32
    %c0_i32_0 = arith.constant 0 : i32
    %c0_i32_1 = arith.constant 0 : i32
    return %c0_i32, %c0_i32_0 : i32, i32
  }
  func.func @transform_2(%arg0: i32, %arg1: i32) -> i32 {
    %c0_i32 = arith.constant 0 : i32
    %c0_i32_0 = arith.constant 0 : i32
    return %c0_i32 : i32
  }
  func.func @transform_3(%arg0: i32, %arg1: i32) -> (i32, i32, i32, i32) {
    %c0_i32 = arith.constant 0 : i32
    %c0_i32_0 = arith.constant 0 : i32
    %c0_i32_1 = arith.constant 0 : i32
    return %arg0, %c0_i32, %arg1, %c0_i32_0 : i32, i32, i32, i32
  }
}

</mosaic_0001>

<bundles_post_ra>
// kernel: tpu_custom_call.1
= control target key start
LH: loop header
LB: loop body
LE: loop exit
PB: predicated region body
PF: predicated region fallthrough
CT: control target
= control target key end

     0   :  { %s1144_s0 = inlined_call_operand.hbm [shape: f32[2,4,8,128], index: 0, kind: input, shape index: {}]   ;;  %s1145_s1 = inlined_call_operand.vmem [shape: f32[8,4], index: 1, kind: input, shape index: {}]   ;;  %s1146_s2 = inlined_call_operand.vmem [shape: f32[8], index: 2, kind: input, shape index: {}]   ;;  %s1147_s3 = inlined_call_operand.hbm [shape: f32[2,8,8,128], index: 3, kind: output, shape index: {}]  }
   0x1   :  { %1154 = sst [smem:[#allocation14_spill]] %s1145_s1 }
   0x2   :  { %8 = vsyncpa [#allocation3], 0 }
   0x3   :  { %10 = vsyncpa [#allocation3 + $0x1], 0 }
   0x4   :  { %11 = vsyncpa [#allocation5], 0 }
   0x5   :  { %12 = vsyncpa [#allocation8], 0 }
   0x6   :  { %13 = vsyncpa [#allocation4], 0 }
   0x7   :  { %15 = vsyncpa [#allocation4 + $0x1], 0  ;;  %s870_s12 = smov 0   ;;  %s872_s13 = smov 0  }
   0x8   :  { %s874_s14 = smov 0   ;;  %s876_s15 = smov 0  }
   0x9   :  { %s878_s16 = smov 0   ;;  %s880_s17 = smov 0  }
   0xa LB: > { %s538_s18 = sadd.s32 4294967295, %s840_s17   ;;  %s539_s19 = sadd.s32 4294967294, %s840_s17   ;;  %s840_s17 = sphi %s880_s17, %s21_s17   ;;  %s836_s16 = sphi %s878_s16, %s1175_s16   ;;  %s832_s15 = sphi %s876_s15, %s1174_s15   ;;  %s828_s14 = sphi %s874_s14, %s1173_s14   ;;  %s824_s13 = sphi %s872_s13, %s1172_s13   ;;  %s820_s12 = sphi %s870_s12, %s1171_s12  }
   0xb   : > { %s42_s20 = sadd.s32 1, %s828_s14  ;;  %p49_p0 = scmp.ne.s32.totalorder %s828_s14, %s824_s13 }
   0xc   : > { %p50_p1 = scmp.eq.s32.totalorder %s840_s17, 0  ;;  %p55_p2 = scmp.ne.s32.totalorder %s824_s13, %s820_s12 }
   0xd   : > { %p908_p3 = scmp.eq.s32.totalorder %s538_s18, 0  ;;  %p123_p4 = scmp.eq.s32.totalorder %s538_s18, 1 }
   0xe   : > { %p912_p5 = por %p50_p1, %p49_p0  ;;  %p129_p6 = scmp.eq.s32.totalorder %s539_s19, 1 }
   0xf   : > { %s1155_s21 = scalar_select %p908_p3, 1, 0 }
  0x10   : > { %p918_p7 = por %p908_p3, %p55_p2  ;;  %p922_p8 = por %p123_p4, %p49_p0 }
  0x11   : > { %p926_p9 = por %p129_p6, %p55_p2  ;;  %p540_p10 = scmp.ge.s32.totalorder %s840_s17, 1 }
  0x12   : > { %s1157_s23 = scalar_select %p918_p7, 1, 0 }
  0x13   : > { %s1158_s24 = scalar_select %p922_p8, 1, 0 }
  0x14   : > { %s1159_s25 = scalar_select %p926_p9, 1, 0 }
  0x15   : > { %p136_p11 = scmp.lt.s32.totalorder %s840_s17, 3  ;;  %s1160_s1 = sld [smem:[#allocation14_spill]] }
  0x16   : > { %p636_p0 = scmp.lt.s32.totalorder %s840_s17, 2  ;;  %s160_s5 = sshll.u32 %s1146_s2, 4  ;;  %s161_s5 = int_to_ptr.vmem [resolvable:$true] %s160_s5 }
  0x17   : > { %p935_p12 = pnand %p540_p10, %p136_p11 }
  0x18   : > { %p948_p2 = pnand %p636_p0, %p912_p5 }
  0x19   : > { %s1161_s29 = scalar_select %p935_p12, 1, 0 }
  0x1a   : > { %p619_p1 = pneg %p935_p12 }
  0x1b   : > { %s149_s28 = sshll.u32 %s1160_s1, 4  ;;  %s150_s28 = int_to_ptr.vmem [resolvable:$true] %s149_s28 }
  0x1c   : > { %s1162_s6 = scalar_select %p948_p2, 1, 0 }
  0x1d   : > { %p954_p4 = pnand %p619_p1, %p908_p3  ;;  %s694_s8 = scalar_lea.vmem %s150_s28, 128 }
  0x1e   : > { %p695_p6 = scmp.ne.s32.totalorder %s150_s28, %s694_s8  ;;  %p702_p9 = scmp.lt.s32.totalorder %s150_s28, %s150_s28 }
  0x1f   : > { %p696_p10 = pneg %p954_p4  ;;  %p703_p8 = scmp.lt.s32.totalorder %s694_s8, %s694_s8 }
  0x21   : > { %p697_p11 = pnand %p696_p10, %p695_p6  ;;  %p704_p7 = por %p703_p8, %p702_p9 }
  0x23   : > { %p698_p13 = pneg %p697_p11 }
  0x25   : > { %p705_p5 = pnand %p704_p7, %p698_p13 }
  0x27   : > { %708 = shalt.err (!%p705_p5)
}
  0x28   : > { %s842_s9 = smov [#allocation6]   ;;  %s709_s10 = scalar_lea.vmem %s161_s5, 16 }
  0x29   : > { %622 = dma.vmem_to_smem (!%p954_p4), %s150_s28, 128, %s842_s9, [#allocation5]  }
  0x2a   : > { %p710_p0 = scmp.ne.s32.totalorder %s161_s5, %s709_s10  ;;  %p717_p12 = scmp.lt.s32.totalorder %s161_s5, %s161_s5 }
  0x2b   : > { %p718_p2 = scmp.lt.s32.totalorder %s709_s10, %s709_s10 }
  0x2c   : > { %p712_p1 = pnand %p710_p0, %p696_p10 }
  0x2d   : > { %p719_p6 = por %p718_p2, %p717_p12 }
  0x2e   : > { %p713_p3 = pneg %p712_p1 }
  0x30   : > { %p720_p11 = pnand %p719_p6, %p713_p3 }
  0x32   : > { %723 = shalt.err (!%p720_p11)
}
  0x33   : > { %s843_s11 = smov [#allocation7]   ;;  %s33_s18 = sadd.s32 1, %s836_s16 }
  0x34   : > { %625 = dma.vmem_to_smem (!%p954_p4), %s161_s5, 16, %s843_s11, [#allocation8]  }
  0x35   : > { %s171_s19 = sand.u32 1, %s828_s14   ;;  %p35_p7 = scmp.ge.s32.totalorder %s33_s18, 2 }
  0x36   : > { %s544_s22 = sshll.u32 %s171_s19, 5  ;;  %s605_s26 = sshll.u32 %s836_s16, 9 }
  0x37   : > { %s1177_s18 = smov (%p35_p7, %s33_s18), 0  ;;  %s182_s30 = scalar_lea.hbm %s1144_s0, %s605_s26 }
  0x38   : > { %s37_s4 = ssub.s32 %s836_s16, %s1177_s18  ;;  %s175_s7 = scalar_lea.vmem [#allocation2], %s544_s22 }
  0x39   : > { %s183_s8 = sshll.u32 %s175_s7, 4  ;;  %p40_p3 = scmp.eq.s32.totalorder %s37_s4, 0  ;;  %s184_s8 = int_to_ptr.vmem [resolvable:$true] %s183_s8 }
  0x3a   : > { %s172_s5 = scalar_lea.sflag [#allocation3], %s171_s19  ;;  %p1164_p8 = scmp.ne.s32.totalorder %s1162_s6, 0 }
  0x3b   : > { %s977_s9 = scalar_select %p40_p3, %s828_s14, %s42_s20  }
  0x3c   : > { %p726_p9 = pneg %p1164_p8  ;;  %s737_s10 = scalar_lea.vmem %s184_s8, 512 }
  0x3d   : > { %p738_p12 = scmp.ne.s32.totalorder %s184_s8, %s737_s10  ;;  %s844_s11 = smov [#allocation2]  }
  0x3e   : > { %s742_s1 = sshll.u32 %s844_s11, 4  ;;  %s743_s1 = int_to_ptr.vmem [resolvable:$false] %s742_s1 }
  0x3f   : > { %p740_p13 = pnand %p738_p12, %p726_p9  ;;  %s744_s27 = scalar_lea.vmem %s743_s1, 1024 }
  0x40   : > { %p745_p4 = scmp.lt.s32.totalorder %s184_s8, %s743_s1  ;;  %p746_p10 = scmp.lt.s32.totalorder %s744_s27, %s737_s10 }
  0x41   : > { %p741_p2 = pneg %p740_p13 }
  0x42   : > { %p747_p5 = por %p746_p10, %p745_p4 }
  0x44   : > { %p748_p0 = pnand %p747_p5, %p741_p2 }
  0x46   : > { %751 = shalt.err (!%p748_p0)
}
  0x47   : > { %s845_s22 = smov 128   ;;  %s846_s20 = smov 8  }
  0x48   : > { %629 = dma.hbm_to_vmem [thread:$0]  (!%p1164_p8), %s182_s30, 512, %s184_s8, %s172_s5, %s845_s22, %s845_s22, %s846_s20  }
  0x49   : > { %p1165_p1 = scmp.ne.s32.totalorder %s1161_s29, 0 }
  0x4a   : > { %s986_s19 = sand.u32 (!%p1165_p1), 1, %s824_s13   ;;  %p1166_p6 = scmp.ne.s32.totalorder (!%p1165_p1), %s1157_s23, 0 }
  0x4b   : > { %195 = sbr.rel (%p1165_p1) target bundleno = 156 (0x9c), region = 32  ;;  %s548_s26 = sshll.u32 (!%p1165_p1), %s986_s19, 5 }
  0x4c   : > { %s198_s1 = scalar_lea.sflag (!%p1165_p1), [#allocation3], %s986_s19  ;;  %s201_s28 = scalar_lea.vmem (!%p1165_p1), [#allocation2], %s548_s26 }
  0x50   : > { %803 = dma.done.wait (%p1166_p6), %s198_s1, 512  }
  0x51   : > { %805 = vsyncadd (%p1166_p6), %s198_s1, 4294966784  ;;  %p1167_p11 = scmp.ne.s32.totalorder %s1155_s21, 0 }
  0x53   : > { %807 = dma.done.wait (%p1167_p11), [#allocation5], 128  }
  0x54   : > { %809 = vsyncadd (%p1167_p11), [#allocation5], 4294967168 }
  0x55   : > { %811 = dma.done.wait (%p1167_p11), [#allocation8], 16  }
  0x56   : > { %813 = vsyncadd (%p1167_p11), [#allocation8], 4294967280 }
  0x57   : > { %214 = sfence }
  0x58   : > { %s233_s29 = sld [smem:[#allocation6]]  ;;  %v1002_v0 = vld [vmem:[%s201_s28] sm:$0xff]  ;;  %v1004_v1 = vld [vmem:[%s201_s28 + $0x8] sm:$0xff]  ;;  %v1007_v5 = vld [vmem:[%s201_s28 + $0x10] sm:$0xff]  ;;  %s551_s20 = sshll.u32 %s986_s19, 6 }
  0x59   : > { %s552_s6 = sld [smem:[#allocation6 + $0x1]]  ;;  %v1012_v8 = vld [vmem:[%s201_s28 + $0x18] sm:$0xff]  ;;  %p1168_p3 = scmp.ne.s32.totalorder %s1158_s24, 0 }
  0x5a   : > { %s553_s30 = sld [smem:[#allocation6 + $0x2]] }
  0x5b   : > { %s554_s4 = sld [smem:[#allocation6 + $0x3]] }
  0x5c   : > { %s265_s7 = sld [smem:[#allocation7]] }
  0x5d   : > { %s555_s23 = sld [smem:[#allocation6 + $0x80]] }
  0x5e   : > { %v283_v2 = vstv %s233_s29  ;;  %s556_s8 = sld [smem:[#allocation6 + $0x81]] }
  0x5f   : > { %v284_v3 = vmul.f32 %v283_v2, %v1002_v0  ;;  %v287_v4 = vstv %s552_s6  ;;  %s557_s5 = sld [smem:[#allocation6 + $0x82]] }
  0x60   : > { %v290_v6 = vstv %s553_s30  ;;  %s1009_s21 = sld [smem:[#allocation6 + $0x83]]  ;;  %v288_v7 = vmul.f32 %v1004_v1, %v287_v4 }
  0x61   : > { %s583_s10 = sld [smem:[#allocation7 + $0x1]]  ;;  %v293_v10 = vstv %s554_s4  ;;  %v291_v12 = vmul.f32 %v1007_v5, %v290_v6  ;;  %s1034_s4 = scalar_lea.vmem [#allocation9], %s551_s20 }
  0x62   : > { %v285_v9 = vstv %s265_s7  ;;  %s559_s11 = sld [smem:[#allocation6 + $0x100]]  ;;  %v294_v17 = vmul.f32 %v1012_v8, %v293_v10 }
  0x63   : > { %v286_v11 = vadd.f32 %v285_v9, %v284_v3  ;;  %v297_v13 = vstv %s555_s23  ;;  %s560_s27 = sld [smem:[#allocation6 + $0x101]] }
  0x64   : > { %v298_v14 = vmul.f32 %v297_v13, %v1002_v0  ;;  %v301_v15 = vstv %s556_s8  ;;  %s1016_s22 = sld [smem:[#allocation6 + $0x102]] }
  0x65   : > { %v289_v16 = vadd.f32 %v288_v7, %v286_v11  ;;  %v304_v18 = vstv %s557_s5  ;;  %s1020_s26 = sld [smem:[#allocation6 + $0x103]]  ;;  %v302_v19 = vmul.f32 %v1004_v1, %v301_v15 }
  0x66   : > { %s584_s1 = sld [smem:[#allocation7 + $0x2]]  ;;  %v307_v22 = vstv %s1009_s21  ;;  %v305_v24 = vmul.f32 %v1007_v5, %v304_v18 }
  0x67   : > { %v292_v20 = vadd.f32 %v291_v12, %v289_v16  ;;  %v299_v21 = vstv %s583_s10  ;;  %s563_s28 = sld [smem:[#allocation6 + $0x180]]  ;;  %v308_v30 = vmul.f32 %v1012_v8, %v307_v22 }
  0x68   : > { %v300_v23 = vadd.f32 %v299_v21, %v298_v14  ;;  %v312_v25 = vstv %s559_s11  ;;  %s1025_s29 = sld [smem:[#allocation6 + $0x181]] }
  0x69   : > { %v295_v26 = vadd.f32 %v294_v17, %v292_v20  ;;  %v313_v27 = vmul.f32 %v312_v25, %v1002_v0  ;;  %v316_v28 = vstv %s560_s27  ;;  %s1028_s6 = sld [smem:[#allocation6 + $0x182]] }
  0x6a   : > { %v303_v29 = vadd.f32 %v302_v19, %v300_v23  ;;  %v319_v31 = vstv %s1016_s22  ;;  %s1032_s30 = sld [smem:[#allocation6 + $0x183]]  ;;  %v317_v32 = vmul.f32 %v1004_v1, %v316_v28 }
  0x6b   : > { %296 = vst [vmem:[%s1034_s4] sm:$0xff] %v295_v26  ;;  %s585_s7 = sld [smem:[#allocation7 + $0x3]]  ;;  %v322_v35 = vstv %s1020_s26  ;;  %v320_v37 = vmul.f32 %v1007_v5, %v319_v31 }
  0x6c   : > { %v306_v33 = vadd.f32 %v305_v24, %v303_v29  ;;  %v314_v34 = vstv %s584_s1  ;;  %s567_s23 = sld [smem:[#allocation6 + $0x200]]  ;;  %v323_v43 = vmul.f32 %v1012_v8, %v322_v35 }
  0x6d   : > { %v315_v36 = vadd.f32 %v314_v34, %v313_v27  ;;  %v327_v38 = vstv %s563_s28  ;;  %s568_s8 = sld [smem:[#allocation6 + $0x201]] }
  0x6e   : > { %v309_v39 = vadd.f32 %v308_v30, %v306_v33  ;;  %v328_v40 = vmul.f32 %v327_v38, %v1002_v0  ;;  %v331_v41 = vstv %s1025_s29  ;;  %s1042_s5 = sld [smem:[#allocation6 + $0x202]] }
  0x6f   : > { %v318_v42 = vadd.f32 %v317_v32, %v315_v36  ;;  %v334_v44 = vstv %s1028_s6  ;;  %s1046_s21 = sld [smem:[#allocation6 + $0x203]]  ;;  %v332_v45 = vmul.f32 %v1004_v1, %v331_v41 }
  0x70   : > { %593 = vst [vmem:[%s1034_s4 + $0x8] sm:$0xff] %v309_v39  ;;  %s586_s10 = sld [smem:[#allocation7 + $0x4]]  ;;  %v337_v48 = vstv %s1032_s30  ;;  %v335_v50 = vmul.f32 %v1007_v5, %v334_v44 }
  0x71   : > { %v321_v46 = vadd.f32 %v320_v37, %v318_v42  ;;  %v329_v47 = vstv %s585_s7  ;;  %s571_s11 = sld [smem:[#allocation6 + $0x280]]  ;;  %v338_v56 = vmul.f32 %v1012_v8, %v337_v48 }
  0x72   : > { %v330_v49 = vadd.f32 %v329_v47, %v328_v40  ;;  %v342_v51 = vstv %s567_s23  ;;  %s572_s27 = sld [smem:[#allocation6 + $0x281]] }
  0x73   : > { %v324_v52 = vadd.f32 %v323_v43, %v321_v46  ;;  %v343_v53 = vmul.f32 %v342_v51, %v1002_v0  ;;  %v346_v54 = vstv %s568_s8  ;;  %s1053_s22 = sld [smem:[#allocation6 + $0x282]] }
  0x74   : > { %v333_v55 = vadd.f32 %v332_v45, %v330_v49  ;;  %v349_v57 = vstv %s1042_s5  ;;  %s1057_s20 = sld [smem:[#allocation6 + $0x283]]  ;;  %v347_v58 = vmul.f32 %v1004_v1, %v346_v54 }
  0x75   : > { %594 = vst [vmem:[%s1034_s4 + $0x10] sm:$0xff] %v324_v52  ;;  %s587_s26 = sld [smem:[#allocation7 + $0x5]]  ;;  %v352_v61 = vstv %s1046_s21  ;;  %v350_v63 = vmul.f32 %v1007_v5, %v349_v57 }
  0x76   : > { %v336_v59 = vadd.f32 %v335_v50, %v333_v55  ;;  %v344_v60 = vstv %s586_s10  ;;  %s575_s1 = sld [smem:[#allocation6 + $0x300]]  ;;  %v353_v9 = vmul.f32 %v1012_v8, %v352_v61  ;;  %s421_s10 = sshll.u32 %s1034_s4, 4  ;;  %s1090_s10 = int_to_ptr.vmem [resolvable:$true] %s421_s10 }
  0x77   : > { %v345_v62 = vadd.f32 %v344_v60, %v343_v53  ;;  %v358_v2 = vstv %s571_s11  ;;  %s576_s28 = sld [smem:[#allocation6 + $0x301]]  ;;  %s606_s11 = sshll.u32 %s832_s15, 10 }
  0x78   : > { %v339_v3 = vadd.f32 %v338_v56, %v336_v59  ;;  %v359_v4 = vmul.f32 %v358_v2, %v1002_v0  ;;  %v362_v6 = vstv %s572_s27  ;;  %s1064_s29 = sld [smem:[#allocation6 + $0x302]]  ;;  %s847_s15 = smov [#allocation9]  }
  0x79   : > { %v348_v7 = vadd.f32 %v347_v58, %v345_v62  ;;  %v365_v10 = vstv %s1053_s22  ;;  %s1068_s6 = sld [smem:[#allocation6 + $0x303]]  ;;  %v363_v11 = vmul.f32 %v1004_v1, %v362_v6 }
  0x7a   : > { %595 = vst [vmem:[%s1034_s4 + $0x18] sm:$0xff] %v339_v3  ;;  %s588_s30 = sld [smem:[#allocation7 + $0x6]]  ;;  %v368_v14 = vstv %s1057_s20  ;;  %v366_v16 = vmul.f32 %v1007_v5, %v365_v10  ;;  %s1095_s20 = scalar_lea.hbm %s1147_s3, %s606_s11 }
  0x7b   : > { %v351_v12 = vadd.f32 %v350_v63, %v348_v7  ;;  %v360_v13 = vstv %s587_s26  ;;  %s579_s7 = sld [smem:[#allocation6 + $0x380]]  ;;  %v369_v22 = vmul.f32 %v1012_v8, %v368_v14  ;;  %s407_s26 = scalar_lea.sflag [#allocation4], %s986_s19 }
  0x7c   : > { %v361_v15 = vadd.f32 %v360_v13, %v359_v4  ;;  %v374_v17 = vstv %s575_s1  ;;  %s580_s23 = sld [smem:[#allocation6 + $0x381]]  ;;  %s752_s1 = scalar_lea.vmem %s1090_s10, 1024 }
  0x7d   : > { %v354_v18 = vadd.f32 %v353_v9, %v351_v12  ;;  %v375_v19 = vmul.f32 %v374_v17, %v1002_v0  ;;  %v378_v20 = vstv %s576_s28  ;;  %s581_s8 = sld [smem:[#allocation6 + $0x382]]  ;;  %p753_p7 = scmp.ne.s32.totalorder %s1090_s10, %s752_s1 }
  0x7e   : > { %v364_v21 = vadd.f32 %v363_v11, %v361_v15  ;;  %v381_v23 = vstv %s1064_s29  ;;  %s582_s5 = sld [smem:[#allocation6 + $0x383]]  ;;  %v379_v24 = vmul.f32 %v1004_v1, %v378_v20  ;;  %s756_s28 = sshll.u32 %s847_s15, 4  ;;  %s757_s28 = int_to_ptr.vmem [resolvable:$false] %s756_s28 }
  0x7f   : > { %596 = vst [vmem:[%s1034_s4 + $0x20] sm:$0xff] %v354_v18  ;;  %s589_s21 = sld [smem:[#allocation7 + $0x7]]  ;;  %v384_v27 = vstv %s1068_s6  ;;  %v382_v29 = vmul.f32 %v1007_v5, %v381_v23  ;;  %p754_p8 = pnand %p753_p7, %p1168_p3 }
  0x80   : > { %v367_v25 = vadd.f32 %v366_v16, %v364_v21  ;;  %v376_v26 = vstv %s588_s30  ;;  %v385_v35 = vmul.f32 %v1012_v8, %v384_v27  ;;  %s758_s29 = scalar_lea.vmem %s757_s28, 2048  ;;  %p759_p12 = scmp.lt.s32.totalorder %s1090_s10, %s757_s28 }
  0x81   : > { %v377_v28 = vadd.f32 %v376_v26, %v375_v19  ;;  %v390_v30 = vstv %s579_s7  ;;  %p755_p9 = pneg %p754_p8  ;;  %p760_p13 = scmp.lt.s32.totalorder %s758_s29, %s752_s1 }
  0x82   : > { %v370_v31 = vadd.f32 %v369_v22, %v367_v25  ;;  %v391_v32 = vmul.f32 %v390_v30, %v1002_v0  ;;  %v394_v33 = vstv %s580_s23 }
  0x83   : > { %v380_v34 = vadd.f32 %v379_v24, %v377_v28  ;;  %v397_v36 = vstv %s581_s8  ;;  %v395_v37 = vmul.f32 %v1004_v1, %v394_v33  ;;  %p761_p2 = por %p760_p13, %p759_p12 }
  0x84   : > { %597 = vst [vmem:[%s1034_s4 + $0x28] sm:$0xff] %v370_v31  ;;  %v400_v40 = vstv %s582_s5  ;;  %v398_v42 = vmul.f32 %v1007_v5, %v397_v36 }
  0x85   : > { %v383_v38 = vadd.f32 %v382_v29, %v380_v34  ;;  %v392_v39 = vstv %s589_s21  ;;  %v401_v44 = vmul.f32 %v1012_v8, %v400_v40  ;;  %p762_p4 = pnand %p761_p2, %p755_p9 }
  0x86   : > { %v393_v41 = vadd.f32 %v392_v39, %v391_v32 }
  0x87   : > { %v386_v0 = vadd.f32 %v385_v35, %v383_v38 }
  0x88   : > { %v396_v43 = vadd.f32 %v395_v37, %v393_v41 }
  0x89   : > { %598 = vst [vmem:[%s1034_s4 + $0x30] sm:$0xff] %v386_v0 }
  0x8a   : > { %v399_v1 = vadd.f32 %v398_v42, %v396_v43 }
  0x8c   : > { %v402_v45 = vadd.f32 %v401_v44, %v399_v1 }
  0x8e   : > { %599 = vst [vmem:[%s1034_s4 + $0x38] sm:$0xff] %v402_v45 }
  0x8f   : > { %765 = shalt.err (!%p762_p4)
}
  0x90   : > { %s766_s4 = scalar_lea.hbm %s1095_s20, 1024  ;;  %s770_s7 = scalar_lea.hbm %s1147_s3, 2048 }
  0x91   : > { %p767_p10 = scmp.ne.s32.totalorder %s1095_s20, %s766_s4  ;;  %p771_p1 = scmp.lt.s32.totalorder %s1095_s20, %s1147_s3 }
  0x92   : > { %p772_p6 = scmp.lt.s32.totalorder %s770_s7, %s766_s4 }
  0x93   : > { %p768_p5 = pnand %p767_p10, %p1168_p3 }
  0x94   : > { %p773_p11 = por %p772_p6, %p771_p1 }
  0x95   : > { %p769_p0 = pneg %p768_p5 }
  0x97   : > { %p774_p7 = pnand %p773_p11, %p769_p0 }
  0x99   : > { %777 = shalt.err (!%p774_p7)
}
  0x9a   : > { %s848_s5 = smov 128   ;;  %s849_s21 = smov 8  }
  0x9b   : > { %617 = dma.vmem_to_hbm [thread:$0]  (%p1168_p3), %s1090_s10, 1024, %s1095_s20, %s407_s26, %s848_s5, %s848_s5, %s849_s21  }
  0x9c PF: > { %s436_s11 = sand.u32 1, %s820_s12   ;;  %p1169_p8 = scmp.ne.s32.totalorder %s1159_s25, 0 }
  0x9d   : > { %p1170_p9 = scmp.ge.s32.totalorder %s840_s17, 2  ;;  %s437_s27 = scalar_lea.sflag [#allocation4], %s436_s11 }
  0x9f   : > { %p631_p12 = pnand %p1170_p9, %p1169_p8 }
  0xa1   : > { %p632_p13 = pneg %p631_p12 }
  0xa3   : > { %815 = dma.done.wait (%p632_p13), %s437_s27, 1024  }
  0xa4   : > { %817 = vsyncadd (%p632_p13), %s437_s27, 4294966272  ;;  %s21_s17 = sadd.s32 1, %s840_s17   ;;  %s1171_s12 = smov %s824_s13 }
  0xa5   : > { %p18_p2 = scmp.ge.s32.totalorder %s21_s17, 4   ;;  %s1172_s13 = smov %s828_s14 }
  0xa6   : > { %s1173_s14 = smov %s977_s9  ;;  %s1174_s15 = smov %s836_s16 }
  0xa7   : > { %s1175_s16 = smov %s1177_s18  ;;  %20 = sbr.rel (!%p18_p2) target bundleno = 10 (0xa), region = 96 }
  0xac   :  { %442 = vsyncpa [#allocation3], 1 }
  0xad   :  { %444 = vsyncpa [#allocation3 + $0x1], 1 }
  0xae   :  { %445 = vsyncpa [#allocation4], 1 }
  0xaf   :  { %447 = vsyncpa [#allocation4 + $0x1], 1 }
  0xb0   :  { %448 = vsyncpa [#allocation5], 1 }
  0xb1   :  { %450 = vsyncpa [#allocation5 + $0x1], 1 }
  0xb2   :  { %451 = vsyncpa [#allocation8], 1 }

</bundles_post_ra>
